<compile_context>
chip_gen: v7x
topology: tpu7x:2x2x1
jax: 0.10.0
libtpu: 0.0.40
codegen_flags: <defaults>
</compile_context>

<pallas_src>
import functools

import jax
import jax.numpy as jnp
from jax import lax
from jax.experimental import pallas as pl
from jax.experimental.pallas import tpu as pltpu


def _round_up(n, m):
    return ((n + m - 1) // m) * m


def _tpu_limits():
    """(vmem_capacity_bytes, tensorcores) with conservative fallbacks."""
    vmem_cap = 64 << 20      # safe on every generation (v7x: 64 MiB per TC)
    cores = 1                # v5e / v6e: one TensorCore per chip
    try:
        info = pltpu.get_tpu_info()
        vmem_cap = int(info.vmem_capacity_bytes)
        for attr in ("num_cores", "tensor_core_count", "num_tensorcores",
                     "cores_per_chip"):
            v = getattr(info, attr, None)
            if v:
                cores = int(v)
                break
    except Exception:
        pass
    return vmem_cap, cores


def _choose_block_b(B, T, D, budget, cores, target_x_block_bytes):
    """Largest bb (multiple of 8) whose tile-padded working set fits `budget`.

    Returns 0 if even bb=8 does not fit (caller must tile the sequence).
    """
    Tp = _round_up(T, 8)
    Dp = _round_up(D, 128)
    row_bytes = Tp * Dp * 4                       # one padded (T, D) row slab
    w_bytes = 2 * 8 * Dp * 4                      # double-buffered (1, D) tile
    per_bb = 2 * (row_bytes + Dp * 4)             # x block + out block, 2 buffers
    bb_budget = (budget - w_bytes) // per_bb
    bb_target = max(1, target_x_block_bytes // row_bytes)
    bb = min(bb_budget, bb_target, _round_up(B, 8))
    bb = (bb // 8) * 8
    if bb < 8:
        return 0
    if cores > 1:
        # Balance the "parallel" batch axis across TensorCores: prefer a step
        # count that is a multiple of the core count (ideally >= 2 per core).
        def steps(cand):
            return -(-B // cand)
        best = None
        for cand in range(bb, 7, -8):
            st = steps(cand)
            if st % cores == 0 and st >= 2 * cores:
                best = cand
                break
        if best is None:
            for cand in range(bb, 7, -8):
                st = steps(cand)
                if st % cores == 0 and st >= cores:
                    best = cand
                    break
        if best is not None:
            bb = best
    return int(bb)


def _attention_kernel(x_ref, w_ref, o_ref):
    """Full-sequence path: x_ref (bb, T, D), w_ref (1, D), o_ref (bb, D)."""
    x = x_ref[...]                                    # (bb, T, D)
    w = w_ref[...]                                    # (1, D) -> broadcasts

    # Scores via VPU multiply + lane reduce; result is lane-dense (T on lanes).
    s = jnp.sum(x * w, axis=-1)                       # (bb, T)
    m = jnp.max(s, axis=-1, keepdims=True)            # (bb, 1)
    e = jnp.exp(s - m)                                 # (bb, T) dense EUP work
    denom = jnp.sum(e, axis=-1, keepdims=True)         # (bb, 1)

    # Weighted sum over T; normalize after the reduction (D muls/row, not T*D).
    acc = jnp.sum(x * e[:, :, None], axis=1)           # (bb, D)
    inv = pl.reciprocal(denom, approx=False)            # (bb, 1), full precision
    o_ref[...] = (acc * inv).astype(o_ref.dtype)


def _attention_seq_tiled_kernel(x_ref, w_ref, o_ref, m_ref, l_ref, acc_ref,
                                *, seq_len, seq_block):
    """Sequence-tiled online-softmax path for rows too large for VMEM."""
    t = pl.program_id(1)

    @pl.when(t == 0)
    def _init():
        m_ref[...] = jnp.full(m_ref.shape, -jnp.inf, dtype=m_ref.dtype)
        l_ref[...] = jnp.zeros(l_ref.shape, dtype=l_ref.dtype)
        acc_ref[...] = jnp.zeros(acc_ref.shape, dtype=acc_ref.dtype)

    x = x_ref[...]                                     # (bb, tt, D)
    w = w_ref[...]                                     # (1, D)

    needs_mask = (seq_len % seq_block) != 0            # static (trace-time)
    if needs_mask:
        offs = t * seq_block + lax.broadcasted_iota(jnp.int32, (1, seq_block), 1)
        valid = offs < seq_len                         # (1, tt)
        # Zero the OOB sequence tail so garbage never reaches the accumulator.
        x = jnp.where(valid[:, :, None], x, 0.0)

    s = jnp.sum(x * w, axis=-1)                        # (bb, tt) lane-dense
    if needs_mask:
        s = jnp.where(valid, s, -jnp.inf)

    m_blk = jnp.max(s, axis=-1, keepdims=True)          # (bb, 1)
    m_new = jnp.maximum(m_ref[...], m_blk)
    alpha = jnp.exp(m_ref[...] - m_new)                  # (bb, 1)
    e = jnp.exp(s - m_new)                               # (bb, tt)
    l_ref[...] = alpha * l_ref[...] + jnp.sum(e, axis=-1, keepdims=True)
    acc_ref[...] = alpha * acc_ref[...] + jnp.sum(x * e[:, :, None], axis=1)
    m_ref[...] = m_new

    @pl.when(t == pl.num_programs(1) - 1)
    def _finalize():
        inv = pl.reciprocal(l_ref[...], approx=False)
        o_ref[...] = (acc_ref[...] * inv).astype(o_ref.dtype)


def attention_forward(x, w, *, seq_block=None, target_block_bytes=16 << 20):
    """x: (B, T, D) f32, w: (D, 1) f32 (PyTorch layout) -> (B, D) f32."""
    B, T, D = x.shape
    w_row = jnp.reshape(w, (1, D))                      # lane-dense weight layout

    vmem_cap, cores = _tpu_limits()
    # Scoped-VMEM budget with headroom below physical VMEM on every generation
    # (v7x 64 MiB -> ~48 MiB budget; v5e/v6e 128 MiB -> ~96 MiB budget).
    budget = max(32 << 20, min(vmem_cap - (16 << 20), 96 << 20))

    Tp = _round_up(T, 8)
    Dp = _round_up(D, 128)
    w_tile_bytes = 2 * 8 * Dp * 4                       # (1, D) pads to (8, Dp)

    bb = 0 if seq_block is not None else _choose_block_b(
        B, T, D, budget, cores, target_block_bytes)

    if bb >= 8:
        # ---- fast path: whole sequence resident per batch block ------------
        vmem_need = (2 * bb * Tp * Dp * 4 +             # x block, double-buffered
                     2 * _round_up(bb, 8) * Dp * 4 +    # out block
                     w_tile_bytes)
        vmem_limit = int(min(max(vmem_need + (2 << 20), 32 << 20), vmem_cap))
        return pl.pallas_call(
            _attention_kernel,
            out_shape=jax.ShapeDtypeStruct((B, D), x.dtype),
            grid_spec=pltpu.PrefetchScalarGridSpec(
                num_scalar_prefetch=0,
                grid=(pl.cdiv(B, bb),),                 # no padding, ragged tail OK
                in_specs=[
                    pl.BlockSpec((bb, T, D), lambda b: (b, 0, 0)),
                    pl.BlockSpec((1, D), lambda b: (0, 0)),   # constant: DMA'd once
                ],
                out_specs=pl.BlockSpec((bb, D), lambda b: (b, 0)),
            ),
            compiler_params=pltpu.CompilerParams(
                dimension_semantics=("parallel",),
                vmem_limit_bytes=vmem_limit,
            ),
        )(x, w_row)

    # ---- sequence-tiled path (online softmax over T) ------------------------
    bb = 8
    scratch_bytes = 2 * 8 * 128 * 4 + 8 * Dp * 4        # m, l, acc accumulators
    if seq_block is not None:
        tt = int(min(_round_up(seq_block, 8), Tp))
    else:
        fixed = 2 * 8 * Dp * 4 + w_tile_bytes + scratch_bytes
        tt = (budget - fixed) // (2 * bb * Dp * 4)
        tt = int(min(max(8, (tt // 8) * 8), Tp))
    vmem_need = 2 * bb * tt * Dp * 4 + 2 * 8 * Dp * 4 + w_tile_bytes + scratch_bytes
    vmem_limit = int(min(max(vmem_need + (2 << 20), 32 << 20), vmem_cap))

    kernel = functools.partial(_attention_seq_tiled_kernel,
                               seq_len=T, seq_block=tt)
    return pl.pallas_call(
        kernel,
        out_shape=jax.ShapeDtypeStruct((B, D), x.dtype),
        grid_spec=pltpu.PrefetchScalarGridSpec(
            num_scalar_prefetch=0,
            grid=(pl.cdiv(B, bb), pl.cdiv(T, tt)),
            in_specs=[
                pl.BlockSpec((bb, tt, D), lambda b, t: (b, t, 0)),
                pl.BlockSpec((1, D), lambda b, t: (0, 0)),
            ],
            out_specs=pl.BlockSpec((bb, D), lambda b, t: (b, 0)),
            scratch_shapes=[
                pltpu.VMEM((bb, 1), jnp.float32),        # running max
                pltpu.VMEM((bb, 1), jnp.float32),        # running denom
                pltpu.VMEM((bb, D), jnp.float32),        # running weighted sum
            ],
        ),
        compiler_params=pltpu.CompilerParams(
            dimension_semantics=("parallel", "arbitrary"),
            vmem_limit_bytes=vmem_limit,
        ),
    )(x, w_row)


def attention_reference(x, w):
    s = jnp.einsum("btd,d->bt", x, jnp.reshape(w, (-1,)))   # (B, T)
    p = jax.nn.softmax(s, axis=1)                            # softmax over T
    return jnp.sum(x * p[..., None], axis=1)                 # (B, D)


if __name__ == "__main__":
    key = jax.random.PRNGKey(0)
    kx, kw, kx2 = jax.random.split(key, 3)

    # Shapes implied by the module: batch=2, seq=8, hidden=32.
    B, T, D = 2, 8, 32
    x = jax.random.normal(kx, (B, T, D), dtype=jnp.float32)

    # xavier_normal_ for the (D, 1) attention parameter: std = sqrt(2/(D+1)).
    std = (2.0 / (D + 1)) ** 0.5
    w = std * jax.random.normal(kw, (D, 1), dtype=jnp.float32)

    out = jax.block_until_ready(attention_forward(x, w))
    ref = attention_reference(x, w)
    assert out.shape == (B, D)
    assert jnp.allclose(out, ref, atol=1e-5, rtol=1e-5)

    # Also exercise the sequence-tiled online-softmax path with ragged batch
    # and sequence tails (B=10 -> batch tail, T=20 with tt=8 -> masked T tail).
    B2, T2 = 10, 20
    x2 = jax.random.normal(kx2, (B2, T2, D), dtype=jnp.float32)
    out2 = jax.block_until_ready(attention_forward(x2, w, seq_block=8))
    ref2 = attention_reference(x2, w)
    assert out2.shape == (B2, D)
    assert jnp.allclose(out2, ref2, atol=1e-5, rtol=1e-5)

    print("KERNEL_OK")
</pallas_src>

<mosaic_0001>
module attributes {stable_mosaic.version = 11 : i64} {
  func.func @_attention_kernel(%arg0: i32, %arg1: memref<8x8x32xf32, #tpu.memory_space<vmem>>, %arg2: memref<1x32xf32, #tpu.memory_space<vmem>>, %arg3: memref<8x32xf32, #tpu.memory_space<vmem>>) attributes {dimension_semantics = [#tpu.dimension_semantics<parallel>], iteration_bounds = array<i64: 1>, scalar_prefetch = 0 : i64, scratch_operands = 0 : i64, tpu.core_type = #tpu.core_type<tc>, window_params = [{transform_indices = @transform_0, window_bounds = array<i64: 8, 8, 32>}, {pipeline_mode = #tpu.pipeline_mode<synchronous>, transform_indices = @transform_1, window_bounds = array<i64: 1, 32>}, {transform_indices = @transform_2, window_bounds = array<i64: 8, 32>}]} {
    %c0 = arith.constant 0 : index
    %c0_0 = arith.constant 0 : index
    %c0_1 = arith.constant 0 : index
    %0 = vector.load %arg1[%c0, %c0_0, %c0_1] : memref<8x8x32xf32, #tpu.memory_space<vmem>>, vector<8x8x32xf32>
    %c0_2 = arith.constant 0 : index
    %c0_3 = arith.constant 0 : index
    %1 = vector.load %arg2[%c0_2, %c0_3] : memref<1x32xf32, #tpu.memory_space<vmem>>, vector<1x32xf32>
    %2 = vector.shape_cast %1 : vector<1x32xf32> to vector<1x1x32xf32>
    %3 = vector.broadcast %2 : vector<1x1x32xf32> to vector<8x8x32xf32>
    %4 = arith.mulf %0, %3 : vector<8x8x32xf32>
    %cst = arith.constant dense<0.000000e+00> : vector<8x8xf32>
    %5 = vector.multi_reduction <add>, %4, %cst [2] : vector<8x8x32xf32> to vector<8x8xf32>
    %cst_4 = arith.constant dense<0xFF800000> : vector<8xf32>
    %6 = vector.multi_reduction <maximumf>, %5, %cst_4 [1] : vector<8x8xf32> to vector<8xf32>
    %7 = vector.shape_cast %6 : vector<8xf32> to vector<8x1xf32>
    %8 = vector.broadcast %7 : vector<8x1xf32> to vector<8x8xf32>
    %9 = arith.subf %5, %8 : vector<8x8xf32>
    %10 = math.exp %9 : vector<8x8xf32>
    %cst_5 = arith.constant dense<0.000000e+00> : vector<8xf32>
    %11 = vector.multi_reduction <add>, %10, %cst_5 [1] : vector<8x8xf32> to vector<8xf32>
    %12 = vector.shape_cast %11 : vector<8xf32> to vector<8x1xf32>
    %13 = vector.shape_cast %10 : vector<8x8xf32> to vector<8x8x1xf32>
    %14 = vector.broadcast %13 : vector<8x8x1xf32> to vector<8x8x32xf32>
    %15 = arith.mulf %0, %14 : vector<8x8x32xf32>
    %cst_6 = arith.constant dense<0.000000e+00> : vector<8x32xf32>
    %16 = vector.multi_reduction <add>, %15, %cst_6 [1] : vector<8x8x32xf32> to vector<8x32xf32>
    %17 = tpu.reciprocal %12 : vector<8x1xf32> -> vector<8x1xf32>
    %18 = vector.broadcast %17 : vector<8x1xf32> to vector<8x32xf32>
    %19 = arith.mulf %16, %18 : vector<8x32xf32>
    %c0_7 = arith.constant 0 : index
    %c0_8 = arith.constant 0 : index
    %20 = vector.load %arg3[%c0_7, %c0_8] : memref<8x32xf32, #tpu.memory_space<vmem>>, vector<8x32xf32>
    tpu.vector_store %arg3[%c0_7, %c0_8], %19 {strides = array<i32>} : memref<8x32xf32, #tpu.memory_space<vmem>>, vector<8x32xf32>,
    return
  }
  func.func @transform_0(%arg0: i32) -> (i32, i32, i32) {
    %c0_i32 = arith.constant 0 : i32
    %c0_i32_0 = arith.constant 0 : i32
    %c0_i32_1 = arith.constant 0 : i32
    return %arg0, %c0_i32, %c0_i32_0 : i32, i32, i32
  }
  func.func @transform_1(%arg0: i32) -> (i32, i32) {
    %c0_i32 = arith.constant 0 : i32
    %c0_i32_0 = arith.constant 0 : i32
    %c0_i32_1 = arith.constant 0 : i32
    return %c0_i32, %c0_i32_0 : i32, i32
  }
  func.func @transform_2(%arg0: i32) -> (i32, i32) {
    %c0_i32 = arith.constant 0 : i32
    %c0_i32_0 = arith.constant 0 : i32
    return %arg0, %c0_i32 : i32, i32
  }
}

</mosaic_0001>

<bundles_post_ra>
// kernel: tpu_custom_call.1
= control target key start
LH: loop header
LB: loop body
LE: loop exit
PB: predicated region body
PF: predicated region fallthrough
CT: control target
= control target key end

     0   :  { %7 = vsyncpa [#allocation3], 0  ;;  %s639_s0 = inlined_call_operand.hbm [shape: f32[2,8,32], index: 0, kind: input, shape index: {}]   ;;  %s640_s1 = inlined_call_operand.vmem [shape: f32[1,32], index: 1, kind: input, shape index: {}]   ;;  %s641_s2 = inlined_call_operand.hbm [shape: f32[2,32], index: 2, kind: output, shape index: {}]  }
   0x1   :  { %8 = vsyncpa [#allocation4], 0 }
   0x2   :  { %13 = vsyncadd [#allocation3], 768  ;;  %s489_s9 = smov [#allocation2]   ;;  %s441_s13 = scalar_lea.hbm %s639_s0, 256 }
   0x3   :  { %s14_s10 = sshll.u32 %s489_s9, 4  ;;  %p442_p0 = scmp.ne.s32.totalorder %s639_s0, %s441_s13  ;;  %s15_s10 = int_to_ptr.vmem [resolvable:$true] %s14_s10 }
   0x4   :  { %p445_p1 = scmp.lt.u32.totalorder %s441_s13, %s639_s0 }
   0x6   :  { %p447_p2 = pnand %p445_p1, %p442_p0 }
   0x8   :  { %450 = shalt.err (!%p447_p2)
}
   0x9   :  { %s451_s18 = scalar_lea.vmem %s15_s10, 256  ;;  %s455_s19 = scalar_lea.vmem %s15_s10, 1024 }
   0xa   :  { %p452_p3 = scmp.ne.s32.totalorder %s15_s10, %s451_s18  ;;  %p456_p4 = scmp.lt.s32.totalorder %s15_s10, %s15_s10 }
   0xb   :  { %p457_p5 = scmp.lt.s32.totalorder %s455_s19, %s451_s18 }
   0xd   :  { %p458_p6 = por %p457_p5, %p456_p4 }
   0xf   :  { %p459_p7 = pnand %p458_p6, %p452_p3 }
  0x11   :  { %462 = shalt.err (!%p459_p7)
}
  0x12   :  { %s490_s20 = smov 128   ;;  %s491_s21 = smov 8  }
  0x13   :  { %20 = dma.hbm_to_vmem [thread:$0]  %s639_s0, 256, %s15_s10, [#allocation3], %s490_s20, %s490_s20, %s491_s21  }
  0x14   :  { %485 = dma.done.wait [#allocation3], 1024  }
  0x15   :  { %486 = vsyncadd [#allocation3], 4294966272  ;;  %v523_v0 = vld [vmem:[#allocation2] sm:$0xff]  ;;  %vm49_vm0 = vcmask 261120   ;;  %v528_v2 = vld [vmem:[#allocation2 + $0x10] sm:$0xff]  ;;  %v82_v25 = vlaneseq  ;;  %vm116_vm1 = vcmask 1041409  }
  0x16   :  { %v413_v1 = vld [vmem:[%s640_s1] ss:$0 sm:$0xff]  ;;  %v532_v5 = vld [vmem:[#allocation2 + $0x8] sm:$0xff]  ;;  %v534_v6 = vld [vmem:[#allocation2 + $0x18] sm:$0xff]  ;;  %vm118_vm2 = vcmask 1042434   ;;  %vm120_vm3 = vcmask 1043459  }
  0x17   :  { %v41_v3 = vmul.f32 %v413_v1, %v523_v0  ;;  %v43_v4 = vmul.f32 %v413_v1, %v528_v2  ;;  %v42_v7 = vmul.f32 %v413_v1, %v532_v5  ;;  %v44_v8 = vmul.f32 %v413_v1, %v534_v6  ;;  %v538_v9 = vld [vmem:[#allocation2 + $0x20] sm:$0xff]  ;;  %v540_v10 = vld [vmem:[#allocation2 + $0x28] sm:$0xff]  ;;  %v548_v17 = vld [vmem:[#allocation2 + $0x30] sm:$0xff] }
  0x18   :  { %v45_v15 = vmul.f32 %v413_v1, %v538_v9  ;;  %v46_v16 = vmul.f32 %v413_v1, %v540_v10  ;;  %v550_v18 = vld [vmem:[#allocation2 + $0x38] sm:$0xff]  ;;  %v47_v21 = vmul.f32 %v413_v1, %v548_v17  ;;  %v83_v26 = vand.u32 127, %v82_v25 }
  0x19   :  { %v50_v11 = vsel %vm49_vm0, %v41_v3, 0.0  ;;  %v56_v12 = vsel %vm49_vm0, %v43_v4, 0.0  ;;  %v53_v13 = vsel %vm49_vm0, %v42_v7, 0.0  ;;  %v59_v14 = vsel %vm49_vm0, %v44_v8, 0.0 }
  0x1a   :  { %51 = vadd.xlane.f32.xlu0 %v50_v11  ;;  %57 = vadd.xlane.f32.xlu1 %v56_v12  ;;  %v62_v19 = vsel %vm49_vm0, %v45_v15, 0.0  ;;  %v65_v20 = vsel %vm49_vm0, %v46_v16, 0.0  ;;  %v48_v22 = vmul.f32 %v413_v1, %v550_v18  ;;  %v68_v23 = vsel %vm49_vm0, %v47_v21, 0.0 }
  0x1b   :  { %v558_v27 = vshrl.u32 %v82_v25, 7  ;;  %vm122_vm4 = vcmask 1044484   ;;  %vm124_vm5 = vcmask 1045509   ;;  %vm126_vm6 = vcmask 1046534  }
  0x1c   :  { %v71_v24 = vsel %vm49_vm0, %v48_v22, 0.0  ;;  %vm128_vm7 = vcmask 1047559   ;;  %vm131_vm8 = vcmask 64512   ;;  %v492_v53 = vmov 0  }
  0x1d   :  { %v561_v30 = vsub.s32 %v83_v26, %v558_v27  ;;  %422 = vset.pattern.permute.xlu0 %v492_v53  ;;  %421 = vset.pattern.permute.xlu1 %v492_v53  ;;  %v138_v54 = vsub.s32 0, %v558_v27  ;;  %v142_v55 = vsub.s32 1, %v558_v27  ;;  %v146_v56 = vsub.s32 2, %v558_v27 }
  0x1e   :  { %54 = vadd.xlane.f32.xlu0 %v53_v13  ;;  %60 = vadd.xlane.f32.xlu1 %v59_v14  ;;  %v150_v57 = vsub.s32 3, %v558_v27  ;;  %v154_v62 = vsub.s32 4, %v558_v27  ;;  %v158_v11 = vsub.s32 5, %v558_v27  ;;  %v162_v15 = vsub.s32 6, %v558_v27 }
  0x1f   :  { %v166_v21 = vsub.s32 7, %v558_v27 }
  0x22   :  { %63 = vadd.xlane.f32.xlu0 %v62_v19  ;;  %66 = vadd.xlane.f32.xlu1 %v65_v20 }
  0x26   :  { %69 = vadd.xlane.f32.xlu0 %v68_v23  ;;  %72 = vadd.xlane.f32.xlu1 %v71_v24 }
  0xa7   :  { %v52_v28 = vpop.xlane.xlu0 %51  ;;  %v58_v29 = vpop.xlane.xlu1 %57 }
  0xa8   :  { %v87_v33 = vrot.slane %v52_v28, %v561_v30  ;;  %v95_v36 = vrot.slane %v58_v29, %v561_v30 }
  0xab   :  { %v55_v31 = vpop.xlane.xlu0 %54  ;;  %v61_v32 = vpop.xlane.xlu1 %60 }
  0xac   :  { %v91_v34 = vrot.slane %v55_v31, %v561_v30  ;;  %v99_v35 = vrot.slane %v61_v32, %v561_v30 }
  0xae   :  { %v117_v37 = vsel %vm116_vm1, %v91_v34, %v87_v33 }
  0xaf   :  { %v119_v38 = vsel %vm118_vm2, %v95_v36, %v117_v37  ;;  %v64_v39 = vpop.xlane.xlu0 %63  ;;  %v67_v40 = vpop.xlane.xlu1 %66 }
  0xb0   :  { %v121_v41 = vsel %vm120_vm3, %v99_v35, %v119_v38  ;;  %v103_v42 = vrot.slane %v64_v39, %v561_v30  ;;  %v107_v43 = vrot.slane %v67_v40, %v561_v30 }
  0xb2   :  { %v123_v44 = vsel %vm122_vm4, %v103_v42, %v121_v41 }
  0xb3   :  { %v70_v45 = vpop.xlane.xlu0 %69  ;;  %v73_v46 = vpop.xlane.xlu1 %72  ;;  %v125_v49 = vsel %vm124_vm5, %v107_v43, %v123_v44 }
  0xb4   :  { %v111_v47 = vrot.slane %v70_v45, %v561_v30  ;;  %v115_v48 = vrot.slane %v73_v46, %v561_v30 }
  0xb6   :  { %v127_v50 = vsel %vm126_vm6, %v111_v47, %v125_v49 }
  0xb7   :  { %v129_v51 = vsel %vm128_vm7, %v115_v48, %v127_v50 }
  0xb8   :  { %v132_v52 = vsel %vm131_vm8, %v129_v51, -inf }
  0xb9   :  { %133 = vmax.xlane.f32.xlu0 %v132_v52 }
 0x146   :  { %v134_v58 = vpop.xlane.xlu0 %133 }
 0x147   :  { %v139_v59 = vrot.slane %v134_v58, %v138_v54  ;;  %v143_v60 = vrot.slane %v134_v58, %v142_v55  ;;  %v147_v61 = vrot.slane %v134_v58, %v146_v56  ;;  %v151_v63 = vrot.slane %v134_v58, %v150_v57 }
 0x148   :  { %v155_v12 = vrot.slane %v134_v58, %v154_v62  ;;  %v159_v16 = vrot.slane %v134_v58, %v158_v11  ;;  %v163_v22 = vrot.slane %v134_v58, %v162_v15 }
 0x149   :  { %v176_v1 = vsub.f32 %v52_v28, %v139_v59  ;;  %v177_v3 = vsub.f32 %v55_v31, %v143_v60  ;;  %v178_v4 = vsub.f32 %v58_v29, %v147_v61  ;;  %v179_v13 = vsub.f32 %v61_v32, %v151_v63 }
 0x14a   :  { %v180_v19 = vsub.f32 %v64_v39, %v155_v12  ;;  %v181_v23 = vsub.f32 %v67_v40, %v159_v16  ;;  %v167_v28 = vrot.slane %v134_v58, %v166_v21  ;;  %v182_v29 = vsub.f32 %v70_v45, %v163_v22 }
 0x14b   :  { %v184_v7 = vmul.f32 1.442695, %v176_v1  ;;  %v186_v8 = vmul.f32 1.442695, %v177_v3  ;;  %v188_v14 = vmul.f32 1.442695, %v178_v4 }
 0x14c   :  { %v190_v20 = vmul.f32 1.442695, %v179_v13  ;;  %v192_v24 = vmul.f32 1.442695, %v180_v19  ;;  %v194_v31 = vmul.f32 1.442695, %v181_v23  ;;  %v183_v33 = vsub.f32 %v73_v46, %v167_v28 }
 0x14d   :  { %423 = vpow2.f32 %v184_v7  ;;  %v196_v34 = vmul.f32 1.442695, %v182_v29 }
 0x14e   :  { %425 = vpow2.f32 %v186_v8  ;;  %v198_v27 = vmul.f32 1.442695, %v183_v33 }
 0x14f   :  { %427 = vpow2.f32 %v188_v14 }
 0x150   :  { %429 = vpow2.f32 %v190_v20 }
 0x151   :  { %431 = vpow2.f32 %v192_v24 }
 0x152   :  { %433 = vpow2.f32 %v194_v31 }
 0x153   :  { %435 = vpow2.f32 %v196_v34 }
 0x154   :  { %437 = vpow2.f32 %v198_v27 }
 0x157   :  { %v424_v25 = vpop.eup %423 }
 0x158   :  { %v426_v26 = vpop.eup %425  ;;  %209 = vperm.xlu1 %421, %v424_v25  }
 0x159   :  { %212 = vperm.xlu0 %422, %v426_v26   ;;  %v428_v32 = vpop.eup %427 }
 0x15a   :  { %v430_v35 = vpop.eup %429 }
 0x15b   :  { %v432_v36 = vpop.eup %431 }
 0x15c   :  { %215 = vperm.xlu1 %421, %v428_v32   ;;  %v434_v37 = vpop.eup %433 }
 0x15d   :  { %v436_v38 = vpop.eup %435 }
 0x15e   :  { %v438_v39 = vpop.eup %437 }
 0x160   :  { %218 = vperm.xlu1 %421, %v430_v35  }
 0x164   :  { %221 = vperm.xlu1 %421, %v432_v36  }
 0x168   :  { %224 = vperm.xlu1 %421, %v434_v37  }
 0x16c   :  { %227 = vperm.xlu1 %421, %v436_v38  }
 0x170   :  { %230 = vperm.xlu1 %421, %v438_v39  }
 0x1d7   :  { %v210_v40 = vpop.permute.xlu1 %209 }
 0x1d8   :  { %v213_v44 = vpop.permute.xlu0 %212  ;;  %v235_v47 = vrot.slane %v210_v40, %v561_v30  ;;  %v283_v3 = vmul.f32 %v210_v40, %v523_v0 }
 0x1d9   :  { %v239_v46 = vrot.slane %v213_v44, %v561_v30  ;;  %v284_v1 = vmul.f32 %v213_v44, %v532_v5 }
 0x1da   :  { %v291_v12 = vsel %vm49_vm0, %v283_v3, 0.0 }
 0x1db   :  { %v216_v41 = vpop.permute.xlu1 %215  ;;  %v264_v52 = vsel %vm116_vm1, %v239_v46, %v235_v47  ;;  %v298_v11 = vsel %vm49_vm0, %v284_v1, 0.0 }
 0x1dc   :  { %v243_v48 = vrot.slane %v216_v41, %v561_v30  ;;  %v285_v4 = vmul.f32 %v216_v41, %v528_v2  ;;  %v299_v15 = vrot.slane %v298_v11, 4  ;;  %v292_v2 = vrot.slane %v291_v12, 4 }
 0x1de   :  { %v265_v54 = vsel %vm118_vm2, %v243_v48, %v264_v52  ;;  %v305_v13 = vsel %vm49_vm0, %v285_v4, 0.0  ;;  %v300_v23 = vadd.f32 %v299_v15, %v298_v11  ;;  %v293_v24 = vadd.f32 %v292_v2, %v291_v12 }
 0x1df   :  { %v219_v42 = vpop.permute.xlu1 %218  ;;  %v306_v16 = vrot.slane %v305_v13, 4 }
 0x1e0   :  { %v247_v49 = vrot.slane %v219_v42, %v561_v30  ;;  %v286_v7 = vmul.f32 %v219_v42, %v534_v6  ;;  %v301_v31 = vrot.slane %v300_v23, 2  ;;  %v294_v32 = vrot.slane %v293_v24, 2 }
 0x1e1   :  { %v307_v25 = vadd.f32 %v306_v16, %v305_v13 }
 0x1e2   :  { %v266_v56 = vsel %vm120_vm3, %v247_v49, %v265_v54  ;;  %v312_v14 = vsel %vm49_vm0, %v286_v7, 0.0  ;;  %v302_v39 = vadd.f32 %v301_v31, %v300_v23  ;;  %v295_v40 = vadd.f32 %v294_v32, %v293_v24 }
 0x1e3   :  { %v222_v43 = vpop.permute.xlu1 %221  ;;  %v308_v33 = vrot.slane %v307_v25, 2 }
 0x1e4   :  { %v251_v50 = vrot.slane %v222_v43, %v561_v30  ;;  %v287_v8 = vmul.f32 %v222_v43, %v538_v9  ;;  %v303_v47 = vrot.slane %v302_v39, 1  ;;  %v296_v48 = vrot.slane %v295_v40, 1 }
 0x1e5   :  { %v309_v41 = vadd.f32 %v308_v33, %v307_v25 }
 0x1e6   :  { %v267_v57 = vsel %vm122_vm4, %v251_v50, %v266_v56  ;;  %v319_v6 = vsel %vm49_vm0, %v287_v8, 0.0  ;;  %v297_v56 = vadd.f32 %v296_v48, %v295_v40 }
 0x1e7   :  { %v225_v45 = vpop.permute.xlu1 %224  ;;  %v320_v21 = vrot.slane %v319_v6, 4  ;;  %v310_v49 = vrot.slane %v309_v41, 1 }
 0x1e8   :  { %v255_v53 = vrot.slane %v225_v45, %v561_v30 }
 0x1e9   :  { %v321_v28 = vadd.f32 %v320_v21, %v319_v6 }
 0x1ea   :  { %v268_v60 = vsel %vm124_vm5, %v255_v53, %v267_v57 }
 0x1eb   :  { %v228_v51 = vpop.permute.xlu1 %227  ;;  %v322_v37 = vrot.slane %v321_v28, 2 }
 0x1ec   :  { %v259_v55 = vrot.slane %v228_v51, %v561_v30  ;;  %v289_v5 = vmul.f32 %v228_v51, %v548_v17 }
 0x1ee   :  { %v269_v61 = vsel %vm126_vm6, %v259_v55, %v268_v60  ;;  %v333_v19 = vsel %vm49_vm0, %v289_v5, 0.0  ;;  %v304_v55 = vadd.f32 %v303_v47, %v302_v39 }
 0x1ef   :  { %v231_v58 = vpop.permute.xlu1 %230  ;;  %v334_v26 = vrot.slane %v333_v19, 4 }
 0x1f0   :  { %v263_v59 = vrot.slane %v231_v58, %v561_v30  ;;  %v288_v30 = vmul.f32 %v225_v45, %v540_v10  ;;  %v290_v0 = vmul.f32 %v231_v58, %v550_v18  ;;  %v313_v10 = vrot.slane %v312_v14, 4 }
 0x1f1   :  { %v335_v35 = vadd.f32 %v334_v26, %v333_v19  ;;  %v323_v45 = vadd.f32 %v322_v37, %v321_v28  ;;  %v311_v58 = vadd.f32 %v310_v49, %v309_v41 }
 0x1f2   :  { %v270_v62 = vsel %vm128_vm7, %v263_v59, %v269_v61  ;;  %v326_v9 = vsel %vm49_vm0, %v288_v30, 0.0  ;;  %v340_v20 = vsel %vm49_vm0, %v290_v0, 0.0  ;;  %v314_v17 = vadd.f32 %v313_v10, %v312_v14 }
 0x1f3   :  { %v272_v63 = vsel %vm131_vm8, %v270_v62, 0.0  ;;  %v327_v22 = vrot.slane %v326_v9, 4  ;;  %v341_v18 = vrot.slane %v340_v20, 4  ;;  %v336_v43 = vrot.slane %v335_v35, 2 }
 0x1f4   :  { %273 = vadd.xlane.f32.xlu1 %v272_v63  ;;  %v315_v34 = vrot.slane %v314_v17, 2  ;;  %v324_v53 = vrot.slane %v323_v45, 1 }
 0x1f5   :  { %v328_v29 = vadd.f32 %v327_v22, %v326_v9  ;;  %v342_v27 = vadd.f32 %v341_v18, %v340_v20  ;;  %v337_v51 = vadd.f32 %v336_v43, %v335_v35 }
 0x1f6   :  { %v316_v42 = vadd.f32 %v315_v34, %v314_v17  ;;  %v325_v4 = vadd.f32 %v324_v53, %v323_v45 }
 0x1f7   :  { %v329_v38 = vrot.slane %v328_v29, 2  ;;  %v343_v44 = vrot.slane %v342_v27, 2  ;;  %v338_v60 = vrot.slane %v337_v51, 1 }
 0x1f8   :  { %v317_v50 = vrot.slane %v316_v42, 1 }
 0x1f9   :  { %v330_v46 = vadd.f32 %v329_v38, %v328_v29  ;;  %v344_v52 = vadd.f32 %v343_v44, %v342_v27  ;;  %v339_v5 = vadd.f32 %v338_v60, %v337_v51 }
 0x1fa   :  { %v318_v59 = vadd.f32 %v317_v50, %v316_v42 }
 0x1fb   :  { %v331_v54 = vrot.slane %v330_v46, 1  ;;  %v345_v61 = vrot.slane %v344_v52, 1 }
 0x1fd   :  { %v332_v7 = vadd.f32 %v331_v54, %v330_v46  ;;  %v346_v0 = vadd.f32 %v345_v61, %v344_v52 }
 0x281   :  { %v274_v36 = vpop.xlane.xlu1 %273 }
 0x282   :  { %439 = vrcp.f32 %v274_v36 }
 0x28c   :  { %v440_v57 = vpop.eup %439 }
 0x28d   :  { %v349_v62 = vrot.slane %v440_v57, 1  ;;  %v350_v63 = vrot.slane %v440_v57, 2  ;;  %v351_v1 = vrot.slane %v440_v57, 3  ;;  %v352_v3 = vrot.slane %v440_v57, 4 }
 0x28e   :  { %v353_v8 = vrot.slane %v440_v57, 5  ;;  %v354_v30 = vrot.slane %v440_v57, 6  ;;  %v355_v11 = vrot.slane %v440_v57, 7  ;;  %v364_v2 = vmul.f32 %v440_v57, %v297_v56 }
 0x28f   :  { %v365_v12 = vmul.f32 %v349_v62, %v304_v55  ;;  %v366_v13 = vmul.f32 %v350_v63, %v311_v58  ;;  %v367_v14 = vmul.f32 %v351_v1, %v318_v59  ;;  %v368_v15 = vmul.f32 %v352_v3, %v325_v4 }
 0x290   :  { %v369_v6 = vmul.f32 %v353_v8, %v332_v7  ;;  %v370_v10 = vmul.f32 %v354_v30, %v339_v5  ;;  %v371_v19 = vmul.f32 %v355_v11, %v346_v0 }
 0x291   :  { %v380_v9 = vrot.slane %v365_v12, 7  ;;  %v382_v16 = vrot.slane %v366_v13, 6  ;;  %v384_v21 = vrot.slane %v367_v14, 5  ;;  %v386_v23 = vrot.slane %v368_v15, 4 }
 0x292   :  { %v388_v25 = vrot.slane %v369_v6, 3  ;;  %v390_v26 = vrot.slane %v370_v10, 2  ;;  %v392_v28 = vrot.slane %v371_v19, 1 }
 0x293   :  { %v381_v20 = vsel %vm116_vm1, %v380_v9, %v364_v2 }
 0x294   :  { %v383_v22 = vsel %vm118_vm2, %v382_v16, %v381_v20 }
 0x295   :  { %v385_v24 = vsel %vm120_vm3, %v384_v21, %v383_v22 }
 0x296   :  { %v387_v17 = vsel %vm122_vm4, %v386_v23, %v385_v24 }
 0x297   :  { %v389_v18 = vsel %vm124_vm5, %v388_v25, %v387_v17 }
 0x298   :  { %v391_v29 = vsel %vm126_vm6, %v390_v26, %v389_v18 }
 0x299   :  { %v393_v31 = vsel %vm128_vm7, %v392_v28, %v391_v29 }
 0x29a   :  { %395 = vst.msk [vmem:[#allocation5] sm:$0xff] %vm49_vm0, %v393_v31 }
 0x29b   :  { %400 = vsyncadd [#allocation4], 96  ;;  %s493_s0 = smov [#allocation5]  }
 0x29c   :  { %s401_s1 = sshll.u32 %s493_s0, 4  ;;  %s402_s1 = int_to_ptr.vmem [resolvable:$true] %s401_s1 }
 0x29d   :  { %s463_s26 = scalar_lea.vmem %s402_s1, 32  ;;  %s467_s27 = scalar_lea.vmem %s402_s1, 128 }
 0x29e   :  { %p464_p8 = scmp.ne.s32.totalorder %s402_s1, %s463_s26  ;;  %p468_p9 = scmp.lt.s32.totalorder %s402_s1, %s402_s1 }
 0x29f   :  { %p469_p10 = scmp.lt.s32.totalorder %s467_s27, %s463_s26 }
 0x2a1   :  { %p470_p11 = por %p469_p10, %p468_p9 }
 0x2a3   :  { %p471_p12 = pnand %p470_p11, %p464_p8 }
 0x2a5   :  { %474 = shalt.err (!%p471_p12)
}
 0x2a6   :  { %s475_s30 = scalar_lea.hbm %s641_s2, 32 }
 0x2a7   :  { %p476_p13 = scmp.ne.s32.totalorder %s641_s2, %s475_s30  ;;  %p479_p0 = scmp.lt.u32.totalorder %s475_s30, %s641_s2 }
 0x2a9   :  { %p481_p1 = pnand %p479_p0, %p476_p13 }
 0x2ab   :  { %484 = shalt.err (!%p481_p1)
}
 0x2ac   :  { %s494_s7 = smov 32   ;;  %s495_s8 = smov 2  }
 0x2ad   :  { %407 = dma.vmem_to_hbm [thread:$0]  %s402_s1, 32, %s641_s2, [#allocation4], %s494_s7, %s494_s7, %s495_s8  }
 0x2ae   :  { %487 = dma.done.wait [#allocation4], 128  }
 0x2af   :  { %488 = vsyncadd [#allocation4], 4294967168 }
 0x2b0   :  { %411 = vsyncpa [#allocation3], 1 }
 0x2b1   :  { %412 = vsyncpa [#allocation4], 1 }

</bundles_post_ra>
